<compile_context>
chip_gen: v7x
topology: tpu7x:2x2x1
jax: 0.10.0
libtpu: 0.0.40
codegen_flags: <defaults>
</compile_context>

<pallas_src>
import functools

import numpy as np
import jax
import jax.numpy as jnp
from jax.experimental import pallas as pl
from jax.experimental.pallas import tpu as pltpu


def _up8(n):
    return ((n + 7) // 8) * 8


def _up128(n):
    return ((n + 127) // 128) * 128


def _slab_layout(D, E, S, B):
    """Row/col offsets of each constant inside the packed parameter slab.
    Every region starts on an 8-row (sublane-tile) boundary."""
    SB = S * B
    o_w1h = 0                       # (D, D)    W1[:, :D].T  (decoder-hidden half)
    o_b1 = o_w1h + _up8(D)          # (1, D)    bias
    o_w2 = o_b1 + 8                 # (1, D)    scoring vector
    o_w = o_w2 + 8                  # (E+B, D)  rows [0:E]=W1[:, D:].T, [E:E+B]=hb (kernel-written)
    o_x = o_w + _up8(E + B)         # (SB, E+B) lanes [0:E]=enc (kernel-written), [E:E+B]=sel_b
    o_sels = o_x + _up8(SB)         # (SB, S)   sel_s[r, s] = 1 iff r // B == s
    o_selbt = o_sels + _up8(SB)     # (B, SB)   sel_b.T
    rows = o_selbt + _up8(B)
    cols = _up128(max(D, E + B, S, SB))
    return dict(rows=rows, cols=cols, o_w1h=o_w1h, o_b1=o_b1, o_w2=o_w2,
                o_w=o_w, o_x=o_x, o_sels=o_sels, o_selbt=o_selbt)


def make_attention_params(W1, b1, w2, *, S, B):
    """One-time ("module init") prep: split/transpose W1, build the 0/1
    selector matrices, and pack everything into ONE f32 slab (single DMA).
    W1: (D, D+E) PyTorch Linear weight with cat order (hidden, encoder);
    b1: (D,); w2: (1, D)."""
    W1 = np.asarray(W1, np.float32)
    b1 = np.asarray(b1, np.float32).reshape(-1)
    w2 = np.asarray(w2, np.float32).reshape(-1)
    D = W1.shape[0]
    E = W1.shape[1] - D
    SB = S * B
    lay = _slab_layout(D, E, S, B)

    rows = np.arange(SB)
    sel_b = (rows[:, None] % B == np.arange(B)[None, :]).astype(np.float32)   # (SB, B)
    sel_s = (rows[:, None] // B == np.arange(S)[None, :]).astype(np.float32)  # (SB, S)

    slab = np.zeros((lay["rows"], lay["cols"]), np.float32)
    slab[lay["o_w1h"]:lay["o_w1h"] + D, :D] = W1[:, :D].T
    slab[lay["o_b1"], :D] = b1
    slab[lay["o_w2"], :D] = w2
    slab[lay["o_w"]:lay["o_w"] + E, :D] = W1[:, D:].T   # rows [E:E+B] left 0 -> hb slot
    slab[lay["o_x"]:lay["o_x"] + SB, E:E + B] = sel_b   # lanes [0:E] left 0 -> enc slot
    slab[lay["o_sels"]:lay["o_sels"] + SB, :S] = sel_s
    slab[lay["o_selbt"]:lay["o_selbt"] + B, :SB] = sel_b.T
    return jnp.asarray(slab)


def _attention_kernel(hid_ref, enc_ref, slab_ref, out_ref, *,
                      D, E, S, B, o_w1h, o_b1, o_w2, o_w, o_x, o_sels, o_selbt):
    # hid_ref  : (B, D)            decoder hidden
    # enc_ref  : (S*B, E)          encoder outputs, natural flatten, row = s*B + b
    # slab_ref : (rows, cols) f32  packed constants (see _slab_layout)
    # out_ref  : (B, S)            softmax(scores)
    SB = S * B

    # --- Assemble X = [enc_flat | sel_b] in the pre-positioned slab region.
    # sel_b arrived in place via the slab DMA (lanes [E:E+B]); only the encoder
    # lanes are written here.  Writes touch the per-call VMEM copy only.
    slab_ref[o_x:o_x + SB, :E] = enc_ref[...]

    # --- hb = hidden @ W1[:, :D].T + b1              (MXU #1, f32 accumulation)
    w1h = slab_ref[o_w1h:o_w1h + D, :D]                              # (D, D)
    b1 = slab_ref[o_b1:o_b1 + 1, :D]                                 # (1, D)
    hb = jnp.dot(hid_ref[...], w1h, preferred_element_type=jnp.float32) + b1  # (B, D)

    # --- Complete W = [[W1[:, D:].T], [hb]] by writing hb into the B spare
    # rows directly below the pre-positioned encoder weights.
    slab_ref[o_w + E:o_w + E + B, :D] = hb

    # --- Fused encoder projection + hidden broadcast  (MXU #2):
    # pre[r] = enc[r] @ W1e^T + hb[r % B]   for flat row r = s*B + b
    x = slab_ref[o_x:o_x + SB, :E + B]                               # (SB, E+B)
    w = slab_ref[o_w:o_w + E + B, :D]                                # (E+B, D)
    a = jnp.tanh(jnp.dot(x, w, preferred_element_type=jnp.float32))  # (SB, D) EUP

    # --- Scoring: VPU multiply + XLU lane reduce (no N=1 MXU matmul).
    w2 = slab_ref[o_w2:o_w2 + 1, :D]                                 # (1, D)
    logit = jnp.sum(a * w2, axis=-1, keepdims=True)                  # (SB, 1)

    # --- De-interleave s-major flat logits into the lane-dense (B, S) output
    # with one selector matmul: out[b, s] = logit[s*B + b]           (MXU #3)
    sel_s = slab_ref[o_sels:o_sels + SB, :S]                         # (SB, S)
    sel_bt = slab_ref[o_selbt:o_selbt + B, :SB]                      # (B, SB)
    logits_bs = jnp.dot(sel_bt, logit * sel_s,
                        preferred_element_type=jnp.float32)          # (B, S)

    # --- Numerically-stable softmax over S (lane axis); single full store.
    m = jnp.max(logits_bs, axis=-1, keepdims=True)
    ex = jnp.exp(logits_bs - m)
    denom = jnp.sum(ex, axis=-1, keepdims=True)
    # approx=True would use the EUP vrcp slot, but misses the 1e-5 check.
    out_ref[...] = ex * pl.reciprocal(denom, approx=False)


@jax.jit
def attention_forward(hidden, encoder_outputs, slab):
    """hidden: (B, D) f32; encoder_outputs: (S, B, E) f32; slab from
    make_attention_params.  Returns (B, S) attention weights (PyTorch layout)."""
    S, B, E = encoder_outputs.shape
    D = hidden.shape[1]
    lay = _slab_layout(D, E, S, B)
    assert slab.shape == (lay["rows"], lay["cols"]), "param slab layout mismatch"

    # Free collapse of the two major dims (row-major): flat row = s*B + b.
    enc_flat = encoder_outputs.reshape(S * B, E)

    kernel = functools.partial(
        _attention_kernel, D=D, E=E, S=S, B=B,
        o_w1h=lay["o_w1h"], o_b1=lay["o_b1"], o_w2=lay["o_w2"],
        o_w=lay["o_w"], o_x=lay["o_x"], o_sels=lay["o_sels"],
        o_selbt=lay["o_selbt"])

    vmem = pl.BlockSpec(memory_space=pltpu.MemorySpace.VMEM)
    return pl.pallas_call(
        kernel,
        out_shape=jax.ShapeDtypeStruct((B, S), jnp.float32),
        in_specs=[vmem, vmem, vmem],
        out_specs=vmem,
    )(hidden, enc_flat, slab)


def _reference(hidden, encoder_outputs, W1, b1, w2):
    S, B, E = encoder_outputs.shape
    D = hidden.shape[1]
    hid_rep = jnp.broadcast_to(hidden[None, :, :], (S, B, D))
    cat = jnp.concatenate([hid_rep, encoder_outputs], axis=2)          # (S, B, D+E)
    attn_hidden = jnp.tanh(jnp.einsum("sbi,oi->sbo", cat, W1) + b1)    # (S, B, D)
    scores = jnp.einsum("sbo,ko->sbk", attn_hidden, w2)[..., 0]        # (S, B)
    scores = jnp.transpose(scores)                                     # (B, S)
    return jax.nn.softmax(scores, axis=1)


if __name__ == "__main__":
    # Small shapes consistent with the module.
    B, S = 2, 8          # batch, max_len (encoder sequence length)
    E, D = 32, 32        # encoder_hidden_dim, decoder_hidden_dim

    key = jax.random.PRNGKey(0)
    k_hid, k_enc, k_w1, k_b1, k_w2 = jax.random.split(key, 5)

    hidden = jax.random.normal(k_hid, (B, D), dtype=jnp.float32)
    encoder_outputs = jax.random.normal(k_enc, (S, B, E), dtype=jnp.float32)

    # Deterministic synthetic parameters (nn.Linear shapes).
    W1 = jax.random.normal(k_w1, (D, D + E), dtype=jnp.float32) * 0.1  # attn_hidden_vector.weight
    b1 = jax.random.normal(k_b1, (D,), dtype=jnp.float32) * 0.1        # attn_hidden_vector.bias
    w2 = jax.random.normal(k_w2, (1, D), dtype=jnp.float32) * 0.1      # attn_scoring_fn.weight

    # One-time prep ("module init"): weights + selector constants -> one slab.
    slab = make_attention_params(W1, b1, w2, S=S, B=B)

    out = attention_forward(hidden, encoder_outputs, slab)
    out = jax.block_until_ready(out)

    ref = _reference(hidden, encoder_outputs, W1, b1, w2)
    assert out.shape == (B, S)
    assert jnp.allclose(out, ref, atol=1e-5, rtol=1e-5), "kernel/reference mismatch"
    assert jnp.allclose(jnp.sum(out, axis=1), 1.0, atol=1e-5)

    print("KERNEL_OK")
</pallas_src>

<mosaic_0001>
module attributes {stable_mosaic.version = 11 : i64} {
  func.func @_attention_kernel(%arg0: memref<2x32xf32, #tpu.memory_space<vmem>>, %arg1: memref<16x32xf32, #tpu.memory_space<vmem>>, %arg2: memref<128x128xf32, #tpu.memory_space<vmem>>, %arg3: memref<2x8xf32, #tpu.memory_space<vmem>>) attributes {dimension_semantics = [], scalar_prefetch = 0 : i64, scratch_operands = 0 : i64, tpu.core_type = #tpu.core_type<tc>} {
    %c0 = arith.constant 0 : index
    %c0_0 = arith.constant 0 : index
    %0 = vector.load %arg1[%c0, %c0_0] : memref<16x32xf32, #tpu.memory_space<vmem>>, vector<16x32xf32>
    %c88 = arith.constant 88 : index
    %c0_1 = arith.constant 0 : index
    %1 = vector.load %arg2[%c88, %c0_1] : memref<128x128xf32, #tpu.memory_space<vmem>>, vector<16x32xf32>
    tpu.vector_store %arg2[%c88, %c0_1], %0 {strides = array<i32>} : memref<128x128xf32, #tpu.memory_space<vmem>>, vector<16x32xf32>,
    %c0_2 = arith.constant 0 : index
    %c0_3 = arith.constant 0 : index
    %2 = vector.load %arg2[%c0_2, %c0_3] : memref<128x128xf32, #tpu.memory_space<vmem>>, vector<32x32xf32>
    %c32 = arith.constant 32 : index
    %c0_4 = arith.constant 0 : index
    %3 = vector.load %arg2[%c32, %c0_4] : memref<128x128xf32, #tpu.memory_space<vmem>>, vector<1x32xf32>
    %c0_5 = arith.constant 0 : index
    %c0_6 = arith.constant 0 : index
    %4 = vector.load %arg0[%c0_5, %c0_6] : memref<2x32xf32, #tpu.memory_space<vmem>>, vector<2x32xf32>
    %cst = arith.constant dense<0.000000e+00> : vector<2x32xf32>
    %5 = tpu.matmul %4, %2, %cst {dimension_numbers = #tpu.dot_dimension_numbers<[1], [0], [0], [1], [0, 0, 1, 1], [], []>} : vector<2x32xf32>, vector<32x32xf32>, vector<2x32xf32> -> vector<2x32xf32>
    %6 = vector.broadcast %3 : vector<1x32xf32> to vector<2x32xf32>
    %7 = arith.addf %5, %6 : vector<2x32xf32>
    %c80 = arith.constant 80 : index
    %c0_7 = arith.constant 0 : index
    %8 = vector.load %arg2[%c80, %c0_7] : memref<128x128xf32, #tpu.memory_space<vmem>>, vector<2x32xf32>
    tpu.vector_store %arg2[%c80, %c0_7], %7 {strides = array<i32>} : memref<128x128xf32, #tpu.memory_space<vmem>>, vector<2x32xf32>,
    %c88_8 = arith.constant 88 : index
    %c0_9 = arith.constant 0 : index
    %9 = vector.load %arg2[%c88_8, %c0_9] : memref<128x128xf32, #tpu.memory_space<vmem>>, vector<16x34xf32>
    %c48 = arith.constant 48 : index
    %c0_10 = arith.constant 0 : index
    %10 = vector.load %arg2[%c48, %c0_10] : memref<128x128xf32, #tpu.memory_space<vmem>>, vector<34x32xf32>
    %cst_11 = arith.constant dense<0.000000e+00> : vector<16x32xf32>
    %11 = tpu.matmul %9, %10, %cst_11 {dimension_numbers = #tpu.dot_dimension_numbers<[1], [0], [0], [1], [0, 0, 1, 1], [], []>} : vector<16x34xf32>, vector<34x32xf32>, vector<16x32xf32> -> vector<16x32xf32>
    %12 = math.tanh %11 : vector<16x32xf32>
    %c40 = arith.constant 40 : index
    %c0_12 = arith.constant 0 : index
    %13 = vector.load %arg2[%c40, %c0_12] : memref<128x128xf32, #tpu.memory_space<vmem>>, vector<1x32xf32>
    %14 = vector.broadcast %13 : vector<1x32xf32> to vector<16x32xf32>
    %15 = arith.mulf %12, %14 : vector<16x32xf32>
    %cst_13 = arith.constant dense<0.000000e+00> : vector<16xf32>
    %16 = vector.multi_reduction <add>, %15, %cst_13 [1] : vector<16x32xf32> to vector<16xf32>
    %17 = vector.shape_cast %16 : vector<16xf32> to vector<16x1xf32>
    %c104 = arith.constant 104 : index
    %c0_14 = arith.constant 0 : index
    %18 = vector.load %arg2[%c104, %c0_14] : memref<128x128xf32, #tpu.memory_space<vmem>>, vector<16x8xf32>
    %c120 = arith.constant 120 : index
    %c0_15 = arith.constant 0 : index
    %19 = vector.load %arg2[%c120, %c0_15] : memref<128x128xf32, #tpu.memory_space<vmem>>, vector<2x16xf32>
    %20 = vector.broadcast %17 : vector<16x1xf32> to vector<16x8xf32>
    %21 = arith.mulf %20, %18 : vector<16x8xf32>
    %cst_16 = arith.constant dense<0.000000e+00> : vector<2x8xf32>
    %22 = tpu.matmul %19, %21, %cst_16 {dimension_numbers = #tpu.dot_dimension_numbers<[1], [0], [0], [1], [0, 0, 1, 1], [], []>} : vector<2x16xf32>, vector<16x8xf32>, vector<2x8xf32> -> vector<2x8xf32>
    %cst_17 = arith.constant dense<0xFF800000> : vector<2xf32>
    %23 = vector.multi_reduction <maximumf>, %22, %cst_17 [1] : vector<2x8xf32> to vector<2xf32>
    %24 = vector.shape_cast %23 : vector<2xf32> to vector<2x1xf32>
    %25 = vector.broadcast %24 : vector<2x1xf32> to vector<2x8xf32>
    %26 = arith.subf %22, %25 : vector<2x8xf32>
    %27 = math.exp %26 : vector<2x8xf32>
    %cst_18 = arith.constant dense<0.000000e+00> : vector<2xf32>
    %28 = vector.multi_reduction <add>, %27, %cst_18 [1] : vector<2x8xf32> to vector<2xf32>
    %29 = vector.shape_cast %28 : vector<2xf32> to vector<2x1xf32>
    %30 = tpu.reciprocal %29 : vector<2x1xf32> -> vector<2x1xf32>
    %31 = vector.broadcast %30 : vector<2x1xf32> to vector<2x8xf32>
    %32 = arith.mulf %27, %31 : vector<2x8xf32>
    %c0_19 = arith.constant 0 : index
    %c0_20 = arith.constant 0 : index
    %33 = vector.load %arg3[%c0_19, %c0_20] : memref<2x8xf32, #tpu.memory_space<vmem>>, vector<2x8xf32>
    tpu.vector_store %arg3[%c0_19, %c0_20], %32 {strides = array<i32>} : memref<2x8xf32, #tpu.memory_space<vmem>>, vector<2x8xf32>,
    return
  }
}

</mosaic_0001>

<bundles_post_ra>
// kernel: attention_forward.1
= control target key start
LH: loop header
LB: loop body
LE: loop exit
PB: predicated region body
PF: predicated region fallthrough
CT: control target
= control target key end

     0   :  { %8 = vsyncpa [#allocation3], 0  ;;  %s584_s0 = inlined_call_operand.vmem [shape: f32[2,32], index: 0, kind: input, shape index: {}]   ;;  %s585_s1 = inlined_call_operand.hbm [shape: f32[16,32], index: 1, kind: input, shape index: {}]   ;;  %s586_s2 = inlined_call_operand.hbm [shape: f32[128,128], index: 2, kind: input, shape index: {}]   ;;  %s587_s3 = inlined_call_operand.hbm [shape: f32[2,8], index: 3, kind: output, shape index: {}]  }
   0x1   :  { %9 = vsyncpa [#allocation6], 0 }
   0x2   :  { %10 = vsyncpa [#allocation4], 0  ;;  %s507_s12 = smov [#allocation2]   ;;  %s435_s16 = scalar_lea.hbm %s585_s1, 256 }
   0x3   :  { %s18_s13 = sshll.u32 %s507_s12, 4  ;;  %p436_p0 = scmp.ne.s32.totalorder %s585_s1, %s435_s16  ;;  %s19_s13 = int_to_ptr.vmem [resolvable:$true] %s18_s13 }
   0x4   :  { %p439_p1 = scmp.lt.u32.totalorder %s435_s16, %s585_s1 }
   0x6   :  { %p441_p2 = pnand %p439_p1, %p436_p0 }
   0x8   :  { %444 = shalt.err (!%p441_p2)
}
   0x9   :  { %s445_s21 = scalar_lea.vmem %s19_s13, 256  ;;  %p450_p4 = scmp.lt.s32.totalorder %s19_s13, %s19_s13 }
   0xa   :  { %p446_p3 = scmp.ne.s32.totalorder %s19_s13, %s445_s21  ;;  %p451_p5 = scmp.lt.s32.totalorder %s445_s21, %s445_s21 }
   0xc   :  { %p452_p6 = por %p451_p5, %p450_p4 }
   0xe   :  { %p453_p7 = pnand %p452_p6, %p446_p3 }
  0x10   :  { %456 = shalt.err (!%p453_p7)
}
  0x11   :  { %s508_s22 = smov 128   ;;  %s509_s23 = smov 8  }
  0x12   :  { %24 = dma.hbm_to_vmem [thread:$0]  %s585_s1, 256, %s19_s13, [#allocation3], %s508_s22, %s508_s22, %s509_s23  }
  0x13   :  { %s510_s26 = smov [#allocation5]   ;;  %s457_s30 = scalar_lea.hbm %s586_s2, 2048 }
  0x14   :  { %s30_s27 = sshll.u32 %s510_s26, 4  ;;  %p458_p8 = scmp.ne.s32.totalorder %s586_s2, %s457_s30  ;;  %s31_s27 = int_to_ptr.vmem [resolvable:$true] %s30_s27 }
  0x15   :  { %p461_p9 = scmp.lt.u32.totalorder %s457_s30, %s586_s2 }
  0x17   :  { %p463_p10 = pnand %p461_p9, %p458_p8 }
  0x19   :  { %466 = shalt.err (!%p463_p10)
}
  0x1a   :  { %s467_s8 = scalar_lea.vmem %s31_s27, 2048  ;;  %p472_p12 = scmp.lt.s32.totalorder %s31_s27, %s31_s27 }
  0x1b   :  { %p468_p11 = scmp.ne.s32.totalorder %s31_s27, %s467_s8  ;;  %p473_p13 = scmp.lt.s32.totalorder %s467_s8, %s467_s8 }
  0x1d   :  { %p474_p0 = por %p473_p13, %p472_p12 }
  0x1f   :  { %p475_p1 = pnand %p474_p0, %p468_p11 }
  0x21   :  { %478 = shalt.err (!%p475_p1)
}
  0x22   :  { %36 = dma.hbm_to_vmem [thread:$0]  %s586_s2, 2048, %s31_s27, [#allocation6], %s508_s22, %s508_s22, %s509_s23  }
  0x23   :  { %501 = dma.done.wait [#allocation3], 256  }
  0x24   :  { %502 = vsyncadd [#allocation3], 4294967040 }
  0x25   :  { %503 = dma.done.wait [#allocation6], 2048  }
  0x26   :  { %504 = vsyncadd [#allocation6], 4294965248  ;;  %v511_v0 = vmov 0.0|0.0   ;;  %vm512_vm0 = vmmov 0   ;;  %v513_v1 = vmov 0.0   ;;  %v48_v2 = vld [vmem:[#allocation5] sm:$0xff] }
  0x27   :  { %402 = vmatprep.subr.bf16.mxu0 %v511_v0  ;;  %379 = vmatprep.mubr.msk.f32.mxu0 %vm512_vm0, %v513_v1  ;;  %v49_v3 = vld [vmem:[#allocation5 + $0x8] sm:$0xff]  ;;  %v50_v4 = vld [vmem:[#allocation5 + $0x10] sm:$0xff]  ;;  %v51_v6 = vld [vmem:[#allocation5 + $0x18] sm:$0xff]  ;;  %vm45_vm1 = vcmask 261120   ;;  %vm140_vm2 = vcmask 277504   ;;  %vm131_vm3 = vcmask 254976  }
  0x28   :  { %v403_v5 = vpack.c.bf16 %v49_v3, %v48_v2  ;;  %v43_v7 = vld [vmem:[#allocation2] sm:$0xff]  ;;  %v44_v8 = vld [vmem:[#allocation2 + $0x8] sm:$0xff]  ;;  %v406_v9 = vpack.c.bf16 %v51_v6, %v50_v4  ;;  %v137_v14 = vld [vmem:[#allocation5 + $0x40] sm:$0xff]  ;;  %vm147_vm4 = vcmask 1041408   ;;  %vm246_vm5 = vcmask 130048  }
  0x29   :  { %46 = vst.msk [vmem:[#allocation5 + $0x58] sm:$0xff] %vm45_vm1, %v43_v7  ;;  %47 = vst.msk [vmem:[#allocation5 + $0x60] sm:$0xff] %vm45_vm1, %v44_v8  ;;  %v53_v10 = vld [vmem:[%s584_s0] sm:$0x3]  ;;  %v136_v12 = vld [vmem:[#allocation5 + $0x38] sm:$0xff]  ;;  %vm320_vm6 = vcmask 58368  }
  0x2a   :  { %404 = vmatpush3.bf16.msra.mxu0 %v403_v5  ;;  %v135_v11 = vld [vmem:[#allocation5 + $0x30] sm:$0xff]  ;;  %v138_v15 = vld [vmem:[#allocation5 + $0x48] sm:$0xff]  ;;  %v349_v18 = vld [vmem:[#allocation5 + $0x20] ss:$0 sm:$0xff]  ;;  %s514_s0 = smov [#allocation7]  }
  0x2b   :  { %405 = vmatprep.subr.bf16.mxu0 %v511_v0  ;;  %v408_v13 = vpack.c.bf16 %v136_v12, %v135_v11  ;;  %v412_v16 = vpack.c.bf16 %v138_v15, %v137_v14  ;;  %v354_v26 = vld [vmem:[#allocation5 + $0x28] ss:$0 sm:$0xff]  ;;  %v242_v35 = vld [vmem:[#allocation5 + $0x70] sm:$0xff]  ;;  %v243_v40 = vld [vmem:[#allocation5 + $0x78] sm:$0x3]  ;;  %s339_s11 = sshll.u32 %s514_s0, 4  ;;  %s340_s11 = int_to_ptr.vmem [resolvable:$true] %s339_s11 }
  0x2c   :  { %v241_v34 = vld [vmem:[#allocation5 + $0x68] sm:$0xff]  ;;  %s479_s12 = scalar_lea.vmem %s340_s11, 32  ;;  %p484_p3 = scmp.lt.s32.totalorder %s340_s11, %s340_s11 }
  0x2d   :  { %409 = vmatprep.subr.bf16.mxu1 %v408_v13  ;;  %p480_p2 = scmp.ne.s32.totalorder %s340_s11, %s479_s12  ;;  %p485_p4 = scmp.lt.s32.totalorder %s479_s12, %s479_s12 }
  0x2e   :  { %407 = vmatpush3.bf16.msra.mxu0 %v406_v9  ;;  %411 = vmatpush3.bf16.msra.mxu1 %v408_v13 }
  0x2f   :  { %416 = vmatprep.subr.bf16.mxu0 %v511_v0  ;;  %413 = vmatprep.subr.bf16.mxu1 %v412_v16  ;;  %p486_p5 = por %p485_p4, %p484_p3 }
  0x30   :  { %v133_v17 = vld [vmem:[#allocation5 + $0x58] sm:$0xff]  ;;  %v134_v23 = vld [vmem:[#allocation5 + $0x60] sm:$0xff] }
  0x31   :  { %380 = vmatmul.mubr.msk.f32.vlgmr.msra.gmra.mrb[0].mxu0 %vm45_vm1, %v53_v10  ;;  %392 = vmatprep.mubr.msk.f32.mxu1 %vm140_vm2, %v133_v17  ;;  %p487_p6 = pnand %p486_p5, %p480_p2 }
  0x32   :  { %399 = vmatprep.mubr.msk.f32.mxu0 %vm512_vm0, %v513_v1  ;;  %415 = vmatpush3.bf16.msra.mxu1 %v412_v16 }
 0x104   :  { %v127_v19 = vpop.f32.mrb[0].mxu0 }
 0x105   :  { %v128_v20 = vadd.f32 %v349_v18, %v127_v19  ;;  %v381_v21 = vpop.f32.mrb[1].mxu0 }
 0x107   :  { %132 = vst.msk [vmem:[#allocation5 + $0x50] sm:$0x3] %vm131_vm3, %v128_v20 }
 0x10e   :  { %v139_v22 = vld [vmem:[#allocation5 + $0x50] sm:$0x3] }
 0x10f   :  { %390 = vmatprep.subr.msk.mxu1 %vm147_vm4, %v139_v22 }
 0x110   :  { %391 = vmatpush3.msk.msra.mxu1 %vm147_vm4, %v139_v22 }
 0x111   :  { %393 = vmatmul.mubr.msk.f32.vlgmr.msra.gmra.mrb[0].mxu1 %vm140_vm2, %v134_v23 }
 0x1e4   :  { %v394_v24 = vpop.f32.mrb[0].mxu1 }
 0x1e5   :  { %427 = vtanh.f32 %v394_v24  ;;  %v217_v25 = vpop.f32.mrb[1].mxu1 }
 0x1e6   :  { %429 = vtanh.f32 %v217_v25 }
 0x1ef   :  { %v428_v27 = vpop.eup %427 }
 0x1f0   :  { %v430_v28 = vpop.eup %429  ;;  %v234_v31 = vmul.f32 %v428_v27, %v354_v26 }
 0x1f1   :  { %v233_v29 = vmul.f32 %v430_v28, %v354_v26 }
 0x1f2   :  { %v238_v32 = vsel %vm45_vm1, %v234_v31, 0.0 }
 0x1f3   :  { %v235_v30 = vsel %vm45_vm1, %v233_v29, 0.0 }
 0x1f4   :  { %236 = vadd.xlane.f32.xlu0 %v235_v30 }
 0x1f8   :  { %239 = vadd.xlane.f32.xlu0 %v238_v32 }
 0x281   :  { %v237_v33 = vpop.xlane.xlu0 %236 }
 0x282   :  { %v244_v37 = vmul.f32 %v241_v34, %v237_v33 }
 0x285   :  { %v240_v36 = vpop.xlane.xlu0 %239 }
 0x286   :  { %v245_v38 = vmul.f32 %v242_v35, %v240_v36 }
 0x288   :  { %v417_v39 = vpack.c.bf16 %v245_v38, %v244_v37 }
 0x28a   :  { %418 = vmatpush3.bf16.msra.mxu0 %v417_v39 }
 0x28d   :  { %400 = vmatmul.mubr.msk.f32.vlgmr.msra.gmra.mrb[2].mxu0 %vm246_vm5, %v243_v40 }
 0x360   :  { %v316_v41 = vpop.f32.mrb[2].mxu0 }
 0x361   :  { %v401_v42 = vpop.f32.mrb[3].mxu0  ;;  %v321_v43 = vsel %vm320_vm6, %v316_v41, -inf }
 0x362   :  { %322 = vmax.xlane.f32.xlu1 %v321_v43 }
 0x3ef   :  { %v323_v44 = vpop.xlane.xlu1 %322 }
 0x3f0   :  { %v324_v45 = vsub.f32 %v316_v41, %v323_v44 }
 0x3f2   :  { %v325_v46 = vmul.f32 1.442695, %v324_v45 }
 0x3f4   :  { %431 = vpow2.f32 %v325_v46 }
 0x3fe   :  { %v432_v47 = vpop.eup %431 }
 0x3ff   :  { %v327_v48 = vsel %vm320_vm6, %v432_v47, 0.0 }
 0x400   :  { %328 = vadd.xlane.f32.xlu1 %v327_v48 }
 0x48d   :  { %v329_v49 = vpop.xlane.xlu1 %328 }
 0x48e   :  { %433 = vrcp.f32 %v329_v49 }
 0x498   :  { %v434_v50 = vpop.eup %433 }
 0x499   :  { %v331_v51 = vmul.f32 %v434_v50, %v432_v47 }
 0x49b   :  { %332 = vst.msk [vmem:[#allocation7] sm:$0x3] %vm320_vm6, %v331_v51 }
 0x49c   :  { %490 = shalt.err (!%p487_p6)
}
 0x49d   :  { %s491_s15 = scalar_lea.hbm %s587_s3, 32 }
 0x49e   :  { %p492_p7 = scmp.ne.s32.totalorder %s587_s3, %s491_s15  ;;  %p495_p8 = scmp.lt.u32.totalorder %s491_s15, %s587_s3 }
 0x4a0   :  { %p497_p9 = pnand %p495_p8, %p492_p7 }
 0x4a2   :  { %500 = shalt.err (!%p497_p9)
}
 0x4a3   :  { %342 = dma.vmem_to_hbm [thread:$0]  %s340_s11, 32, %s587_s3, [#allocation4]  }
 0x4a4   :  { %505 = dma.done.wait [#allocation4], 32  }
 0x4a5   :  { %506 = vsyncadd [#allocation4], 4294967264 }
 0x4a6   :  { %346 = vsyncpa [#allocation3], 1 }
 0x4a7   :  { %347 = vsyncpa [#allocation6], 1 }
 0x4a8   :  { %348 = vsyncpa [#allocation4], 1 }

</bundles_post_ra>
